<compile_context>
chip_gen: v7x
topology: tpu7x:2x2x1
jax: 0.10.0
libtpu: 0.0.40
codegen_flags: <defaults>
</compile_context>

<pallas_src>
from functools import partial

import jax
import jax.numpy as jnp
from jax import lax
from jax.experimental import pallas as pl
from jax.experimental.pallas import tpu as pltpu


def _round_up(x, m):
    return ((x + m - 1) // m) * m


def _vmem_capacity_bytes():
    try:
        return int(pltpu.get_tpu_info().vmem_capacity_bytes)
    except Exception:
        return 64 << 20  # conservative: v7x per-TensorCore VMEM


# ----------------------------- Pallas kernel -------------------------------

def _make_conv_gemm_kernel(tk, resident_weight):
    def kernel(p_ref, w_ref, b_ref, o_ref, acc_ref):
        # p_ref  : (tk, tp)                      im2col patch tile (K sublanes, pixels lanes)
        # w_ref  : (Cout_pad, K_pad) resident    OR (Cout_pad, tk) streamed
        # b_ref  : (Cout_pad, 1)                 bias column (f32)
        # o_ref  : (Cout_pad, tp)                lane-dense output tile
        # acc_ref: (Cout_pad, tp)                f32 accumulator scratch
        k = pl.program_id(1)

        @pl.when(k == 0)
        def _():
            # bias folded into the accumulator init: epilogue is just cast+store
            acc_ref[...] = jnp.broadcast_to(b_ref[...], acc_ref.shape)

        if resident_weight:
            koff = pl.multiple_of(k * tk, tk)
            w = w_ref[:, pl.ds(koff, tk)]
        else:
            w = w_ref[...]

        acc_ref[...] += jnp.dot(w, p_ref[...], preferred_element_type=jnp.float32)

        @pl.when(k == pl.num_programs(1) - 1)
        def _():
            o_ref[...] = acc_ref[...].astype(o_ref.dtype)

    return kernel


def conv_gemm(patches, w_mat, bias_col, out_dtype, *, tp, tk, resident_weight, vmem_limit):
    """patches: (K_pad, NP_pad); w_mat: (Cout_pad, K_pad); bias_col: (Cout_pad, 1) f32.
    Returns (Cout_pad, NP_pad) in out_dtype."""
    K_pad, NP_pad = patches.shape
    Cout_pad = w_mat.shape[0]
    grid = (NP_pad // tp, K_pad // tk)

    if resident_weight:
        # Constant block index -> Pallas DMAs the weight exactly once; sliced in-kernel.
        w_spec = pl.BlockSpec((Cout_pad, K_pad), lambda j, k: (0, 0))
    else:
        w_spec = pl.BlockSpec((Cout_pad, tk), lambda j, k: (0, k))

    return pl.pallas_call(
        _make_conv_gemm_kernel(tk, resident_weight),
        out_shape=jax.ShapeDtypeStruct((Cout_pad, NP_pad), out_dtype),
        grid_spec=pltpu.PrefetchScalarGridSpec(
            num_scalar_prefetch=0,
            grid=grid,
            in_specs=[
                pl.BlockSpec((tk, tp), lambda j, k: (k, j)),
                w_spec,
                pl.BlockSpec((Cout_pad, 1), lambda j, k: (0, 0)),
            ],
            out_specs=pl.BlockSpec((Cout_pad, tp), lambda j, k: (0, j)),
            scratch_shapes=[pltpu.VMEM((Cout_pad, tp), jnp.float32)],
        ),
        compiler_params=pltpu.CompilerParams(
            dimension_semantics=("parallel", "arbitrary"),
            vmem_limit_bytes=int(vmem_limit),
        ),
    )(patches, w_mat, bias_col)


# ------------------------------- glue (JAX) --------------------------------

def _im2col_flat(x, ksize, stride, padding, dilation):
    """im2col with batch flattened into the pixel axis.  Returns (K, N*P):
       K order = (cin, kd, kh, kw)  (matches weight.reshape(Cout, Cin*KD*KH*KW)),
       pixel order = (n, od, oh, ow)."""
    N, C, D, H, W = x.shape
    kd, kh, kw = ksize
    sd, sh, sw = stride
    pd, ph, pw = padding
    dd, dh, dw = dilation
    OD = (D + 2 * pd - dd * (kd - 1) - 1) // sd + 1
    OH = (H + 2 * ph - dh * (kh - 1) - 1) // sh + 1
    OW = (W + 2 * pw - dw * (kw - 1) - 1) // sw + 1
    xp = jnp.pad(x, ((0, 0), (0, 0), (pd, pd), (ph, ph), (pw, pw)))
    taps = []
    for i in range(kd):
        for j in range(kh):
            for k in range(kw):
                d0, h0, w0 = i * dd, j * dh, k * dw
                taps.append(xp[:, :,
                               d0:d0 + sd * (OD - 1) + 1:sd,
                               h0:h0 + sh * (OH - 1) + 1:sh,
                               w0:w0 + sw * (OW - 1) + 1:sw])
    pat = jnp.stack(taps, axis=0)                       # (T, N, C, OD, OH, OW)
    pat = jnp.transpose(pat, (2, 0, 1, 3, 4, 5))        # (C, T, N, OD, OH, OW)
    pat = pat.reshape(C * kd * kh * kw, N * OD * OH * OW)
    return pat, (OD, OH, OW)


def _plan(K, NPix, Cout_pad, isz, osz, budget):
    """Pick K/pixel tiles, weight residency and a vmem_limit that always covers the footprint."""
    K_pad = _round_up(K, 128)
    if K_pad <= 2048:
        tk = K_pad                                      # single K step
    else:
        tk = 512                                        # 256-aligned chunks (v6e/v7x MXU friendly)
        K_pad = _round_up(K_pad, tk)

    w_bytes = Cout_pad * K_pad * isz
    resident_w = w_bytes <= budget // 4                 # keep weight in VMEM, DMA'd exactly once

    def footprint(tp):
        f = 2 * tk * tp * isz                           # patch double buffer
        f += 2 * (w_bytes if resident_w else Cout_pad * tk * isz)
        f += 2 * Cout_pad * tp * osz                    # output double buffer
        f += Cout_pad * tp * 4                          # f32 accumulator
        f += 2 * Cout_pad * 4                           # bias column
        return f

    best = None
    for tp in (2048, 1536, 1024, 768, 512, 384, 256, 128):   # lane-dense multiples of 128
        if tp > max(128, _round_up(NPix, 128)) or footprint(tp) > budget:
            continue
        key = (_round_up(NPix, tp) - NPix, -tp)         # minimize padding, then prefer larger tiles
        if best is None or key < best[0]:
            best = (key, tp)
    tp = best[1] if best is not None else 128
    NP_pad = _round_up(NPix, tp)

    fp = footprint(tp)
    vmem_limit = max(fp + (4 << 20), min(max(2 * fp, 16 << 20), budget))
    return tk, K_pad, tp, NP_pad, resident_w, vmem_limit


def conv3d_pallas(x_ncdhw, weight_oidhw, bias, stride, padding, dilation, groups,
                  compute_dtype=jnp.bfloat16):
    # TODO(synk): grouped conv (groups > 1) not implemented in the Pallas path.
    assert groups == 1
    Cout, Cin, KD, KH, KW = weight_oidhw.shape
    N = x_ncdhw.shape[0]
    out_dtype = x_ncdhw.dtype
    isz = jnp.dtype(compute_dtype).itemsize
    osz = jnp.dtype(out_dtype).itemsize

    # Cast FIRST so the amplified im2col tensor is produced directly in compute_dtype.
    x_c = x_ncdhw.astype(compute_dtype)
    patches, (OD, OH, OW) = _im2col_flat(x_c, (KD, KH, KW), stride, padding, dilation)
    K = Cin * KD * KH * KW
    NPix = N * OD * OH * OW

    sub = max(8, 32 // isz)                             # sublane packing: 8 (f32) / 16 (bf16)
    Cout_pad = _round_up(Cout, sub)
    budget = _vmem_capacity_bytes() * 3 // 4            # ~48 MiB/TC on v7x, ~96 MiB on v5e/v6e
    tk, K_pad, tp, NP_pad, resident_w, vmem_limit = _plan(K, NPix, Cout_pad, isz, osz, budget)

    patches = jnp.pad(patches, ((0, K_pad - K), (0, NP_pad - NPix)))
    w_mat = weight_oidhw.reshape(Cout, K)               # K order = (cin, kd, kh, kw) == patch order
    w_mat = jnp.pad(w_mat, ((0, Cout_pad - Cout), (0, K_pad - K))).astype(compute_dtype)
    if bias is None:
        bias = jnp.zeros((Cout,), jnp.float32)
    bias_col = jnp.pad(bias.astype(jnp.float32), (0, Cout_pad - Cout)).reshape(Cout_pad, 1)

    out = conv_gemm(patches, w_mat, bias_col, out_dtype, tp=tp, tk=tk,
                    resident_weight=resident_w, vmem_limit=vmem_limit)
    out = out[:Cout, :NPix].reshape(Cout, N, OD, OH, OW)
    return jnp.transpose(out, (1, 0, 2, 3, 4))          # -> NCDHW


def flora_new_weight(param_G, params, scale):
    # Replicates FLoRALayer.forward(style='v2') — tiny contractions, kept in JAX glue.
    dt = jnp.tensordot(param_G, params[0], axes=[[0], [1]])
    for p in params[1:]:
        dt = jnp.tensordot(dt, p, axes=[[0], [1]])
    dt = jnp.swapaxes(dt, 0, 1)                         # (Cout, Cin, KD, KH, KW)
    return scale * dt


@partial(jax.jit, static_argnames=("stride", "padding", "dilation", "groups", "compute_dtype"))
def conv3d_flora_forward(x, base_w, base_b, param_G, flora_params, scale, *,
                         stride, padding, dilation, groups, compute_dtype=jnp.bfloat16):
    # flora_dropout is identity (drop_rate=0 / eval mode), so both conv branches see the same
    # input and fuse EXACTLY: conv(x, W_base) + b + conv(x, W_flora) == conv(x, W_base+W_flora) + b.
    new_w = flora_new_weight(param_G, flora_params, scale).astype(base_w.dtype)
    fused_w = base_w + new_w        # fused in f32; cast to compute_dtype happens in conv3d_pallas
    return conv3d_pallas(x, fused_w, base_b, stride, padding, dilation, groups,
                         compute_dtype=compute_dtype)


# --------------------------------- main -------------------------------------

if __name__ == "__main__":
    key = jax.random.PRNGKey(0)
    N, Cin, Cout = 2, 4, 8
    D = H = W = 8
    KD = KH = KW = 3
    stride, padding, dilation, groups = (1, 1, 1), (1, 1, 1), (1, 1, 1), 1
    r = [2, 2, 2, 2, 2]
    scale = 100.0                                      # makes the FLoRA branch non-trivial
    dims = [Cin, Cout, KD, KH, KW]                     # FLoRA dims order for conv3d

    keys = jax.random.split(key, 9)
    x = jax.random.normal(keys[0], (N, Cin, D, H, W), jnp.float32)
    base_w = jax.random.normal(keys[1], (Cout, Cin, KD, KH, KW), jnp.float32) * 0.1
    base_b = jax.random.normal(keys[2], (Cout,), jnp.float32) * 0.1
    # Deterministic FLoRA params. (FLoRALayer.init_parameters zeroes param_G, which would make the
    # FLoRA branch trivially zero; use nonzero values so the branch is exercised.)
    param_G = jax.random.normal(keys[3], tuple(r), jnp.float32)
    flora_params = [jax.random.normal(keys[4 + i], (dims[i], r[i]), jnp.float32) * 0.1
                    for i in range(5)]

    # Reference (XLA conv), computed as the un-fused module would: base + bias + flora.
    new_w = flora_new_weight(param_G, flora_params, scale)
    dn = lax.conv_dimension_numbers(x.shape, base_w.shape, ("NCDHW", "OIDHW", "NCDHW"))

    def ref_conv(w):
        return lax.conv_general_dilated(x, w, window_strides=stride,
                                        padding=[(p, p) for p in padding],
                                        rhs_dilation=dilation,
                                        dimension_numbers=dn,
                                        feature_group_count=groups)

    ref = ref_conv(base_w) + base_b.reshape(1, Cout, 1, 1, 1) + ref_conv(new_w)

    # 1) Strict check with f32 compute.
    out_f32 = conv3d_flora_forward(x, base_w, base_b, param_G, flora_params, scale,
                                   stride=stride, padding=padding, dilation=dilation,
                                   groups=groups, compute_dtype=jnp.float32)
    out_f32 = jax.block_until_ready(out_f32)
    assert out_f32.shape == ref.shape == (N, Cout, D, H, W)
    assert jnp.allclose(out_f32, ref, atol=1e-4, rtol=1e-4)

    # 2) Recommended perf path: bf16 inputs, f32 MXU accumulation (relaxed tolerance; the bf16 cast
    #    of the fused weight dominates the error for large FLoRA scales).
    out_bf16 = conv3d_flora_forward(x, base_w, base_b, param_G, flora_params, scale,
                                    stride=stride, padding=padding, dilation=dilation,
                                    groups=groups, compute_dtype=jnp.bfloat16)
    out_bf16 = jax.block_until_ready(out_bf16)
    max_ref = jnp.max(jnp.abs(ref))
    assert jnp.max(jnp.abs(out_bf16 - ref)) <= 0.05 * max_ref + 1e-3

    print("KERNEL_OK")
</pallas_src>

<mosaic_0001>
module attributes {stable_mosaic.version = 11 : i64} {
  func.func @kernel(%arg0: i32, %arg1: i32, %arg2: memref<128x1024xf32, #tpu.memory_space<vmem>>, %arg3: memref<8x128xf32, #tpu.memory_space<vmem>>, %arg4: memref<8x1xf32, #tpu.memory_space<vmem>>, %arg5: memref<8x1024xf32, #tpu.memory_space<vmem>>, %arg6: memref<8x1024xf32, #tpu.memory_space<vmem>>) attributes {dimension_semantics = [#tpu.dimension_semantics<parallel>, #tpu.dimension_semantics<arbitrary>], iteration_bounds = array<i64: 1, 1>, scalar_prefetch = 0 : i64, scratch_operands = 1 : i64, tpu.core_type = #tpu.core_type<tc>, window_params = [{transform_indices = @transform_0, window_bounds = array<i64: 128, 1024>}, {pipeline_mode = #tpu.pipeline_mode<synchronous>, transform_indices = @transform_1, window_bounds = array<i64: 8, 128>}, {pipeline_mode = #tpu.pipeline_mode<synchronous>, transform_indices = @transform_2, window_bounds = array<i64: 8, 1>}, {transform_indices = @transform_3, window_bounds = array<i64: 8, 1024>}]} {
    %c0_i32 = arith.constant 0 : i32
    %0 = arith.cmpi eq, %arg1, %c0_i32 : i32
    %1 = arith.extui %0 : i1 to i32
    %c0_i32_0 = arith.constant 0 : i32
    %2 = arith.cmpi ne, %1, %c0_i32_0 : i32
    scf.if %2 {
      %c0_9 = arith.constant 0 : index
      %c0_10 = arith.constant 0 : index
      %15 = vector.load %arg4[%c0_9, %c0_10] : memref<8x1xf32, #tpu.memory_space<vmem>>, vector<8x1xf32>
      %16 = vector.shape_cast %15 : vector<8x1xf32> to vector<8x1xf32>
      %17 = vector.broadcast %16 : vector<8x1xf32> to vector<8x1024xf32>
      %c0_11 = arith.constant 0 : index
      %c0_12 = arith.constant 0 : index
      %18 = vector.load %arg6[%c0_11, %c0_12] : memref<8x1024xf32, #tpu.memory_space<vmem>>, vector<8x1024xf32>
      tpu.vector_store %arg6[%c0_11, %c0_12], %17 {strides = array<i32>} : memref<8x1024xf32, #tpu.memory_space<vmem>>, vector<8x1024xf32>,
    } else {
    }
    %c128_i32 = arith.constant 128 : i32
    %3 = arith.muli %arg1, %c128_i32 : i32
    %4 = tpu.assume_multiple %3, 128 : i32
    %c0 = arith.constant 0 : index
    %5 = arith.index_cast %4 : i32 to index
    %6 = vector.load %arg3[%c0, %5] : memref<8x128xf32, #tpu.memory_space<vmem>>, vector<8x128xf32>
    %c0_1 = arith.constant 0 : index
    %c0_2 = arith.constant 0 : index
    %7 = vector.load %arg6[%c0_1, %c0_2] : memref<8x1024xf32, #tpu.memory_space<vmem>>, vector<8x1024xf32>
    %c0_3 = arith.constant 0 : index
    %c0_4 = arith.constant 0 : index
    %8 = vector.load %arg2[%c0_3, %c0_4] : memref<128x1024xf32, #tpu.memory_space<vmem>>, vector<128x1024xf32>
    %cst = arith.constant dense<0.000000e+00> : vector<8x1024xf32>
    %9 = tpu.matmul %6, %8, %cst {dimension_numbers = #tpu.dot_dimension_numbers<[1], [0], [0], [1], [0, 0, 1, 1], [], []>} : vector<8x128xf32>, vector<128x1024xf32>, vector<8x1024xf32> -> vector<8x1024xf32>
    %10 = arith.addf %7, %9 : vector<8x1024xf32>
    %c0_5 = arith.constant 0 : index
    %c0_6 = arith.constant 0 : index
    %11 = vector.load %arg6[%c0_5, %c0_6] : memref<8x1024xf32, #tpu.memory_space<vmem>>, vector<8x1024xf32>
    tpu.vector_store %arg6[%c0_5, %c0_6], %10 {strides = array<i32>} : memref<8x1024xf32, #tpu.memory_space<vmem>>, vector<8x1024xf32>,
    %c0_i32_7 = arith.constant 0 : i32
    %12 = arith.cmpi eq, %arg1, %c0_i32_7 : i32
    %13 = arith.extui %12 : i1 to i32
    %c0_i32_8 = arith.constant 0 : i32
    %14 = arith.cmpi ne, %13, %c0_i32_8 : i32
    scf.if %14 {
      %c0_9 = arith.constant 0 : index
      %c0_10 = arith.constant 0 : index
      %15 = vector.load %arg6[%c0_9, %c0_10] : memref<8x1024xf32, #tpu.memory_space<vmem>>, vector<8x1024xf32>
      %c0_11 = arith.constant 0 : index
      %c0_12 = arith.constant 0 : index
      %16 = vector.load %arg5[%c0_11, %c0_12] : memref<8x1024xf32, #tpu.memory_space<vmem>>, vector<8x1024xf32>
      tpu.vector_store %arg5[%c0_11, %c0_12], %15 {strides = array<i32>} : memref<8x1024xf32, #tpu.memory_space<vmem>>, vector<8x1024xf32>,
    } else {
    }
    return
  }
  func.func @transform_0(%arg0: i32, %arg1: i32) -> (i32, i32) {
    %c0_i32 = arith.constant 0 : i32
    return %arg1, %arg0 : i32, i32
  }
  func.func @transform_1(%arg0: i32, %arg1: i32) -> (i32, i32) {
    %c0_i32 = arith.constant 0 : i32
    %c0_i32_0 = arith.constant 0 : i32
    %c0_i32_1 = arith.constant 0 : i32
    return %c0_i32, %c0_i32_0 : i32, i32
  }
  func.func @transform_2(%arg0: i32, %arg1: i32) -> (i32, i32) {
    %c0_i32 = arith.constant 0 : i32
    %c0_i32_0 = arith.constant 0 : i32
    %c0_i32_1 = arith.constant 0 : i32
    return %c0_i32, %c0_i32_0 : i32, i32
  }
  func.func @transform_3(%arg0: i32, %arg1: i32) -> (i32, i32) {
    %c0_i32 = arith.constant 0 : i32
    %c0_i32_0 = arith.constant 0 : i32
    return %c0_i32, %arg0 : i32, i32
  }
}

</mosaic_0001>

<bundles_post_ra>
// kernel: conv3d_flora_forward.1
= control target key start
LH: loop header
LB: loop body
LE: loop exit
PB: predicated region body
PF: predicated region fallthrough
CT: control target
= control target key end

     0   :  { %v628_v3 = vmov 0.0   ;;  %v629_v8 = vmov 0   ;;  %s1074_s0 = inlined_call_operand.vmem [shape: f32[128,1024], index: 0, kind: input, shape index: {}]   ;;  %s1075_s1 = inlined_call_operand.vmem [shape: f32[8,128], index: 1, kind: input, shape index: {}]   ;;  %s1076_s2 = inlined_call_operand.vmem [shape: f32[8,1], index: 2, kind: input, shape index: {}]   ;;  %s1077_s3 = inlined_call_operand.vmem [shape: f32[8,1024], index: 3, kind: output, shape index: {}]  }
   0x1   :  { %v46_v0 = vld [vmem:[%s1074_s0 + $0x8] sm:$0xff]  ;;  %v48_v2 = vld [vmem:[%s1074_s0 + $0x18] sm:$0xff]  ;;  %237 = vmatprep.mubr.f32.mxu0 %v628_v3  ;;  %308 = vmatprep.mubr.f32.mxu1 %v628_v3  ;;  %v45_v6 = vld [vmem:[%s1074_s0] sm:$0xff] }
   0x2   :  { %v54_v1 = vld [vmem:[%s1074_s0 + $0x48] sm:$0xff]  ;;  %v56_v5 = vld [vmem:[%s1074_s0 + $0x58] sm:$0xff]  ;;  %v53_v7 = vld [vmem:[%s1074_s0 + $0x40] sm:$0xff]  ;;  %627 = vset.pattern.permute.xlu0 %v629_v8 }
   0x3   :  { %v497_v4 = vpack.c.bf16 %v54_v1, %v46_v0  ;;  %v529_v9 = vpack.c.bf16 %v56_v5, %v48_v2  ;;  %v499_v10 = vpack.c.bf16 %v53_v7, %v45_v6  ;;  %v47_v11 = vld [vmem:[%s1074_s0 + $0x10] sm:$0xff]  ;;  %v62_v13 = vld [vmem:[%s1074_s0 + $0x88] sm:$0xff]  ;;  %v64_v16 = vld [vmem:[%s1074_s0 + $0x98] sm:$0xff] }
   0x4   :  { %v55_v12 = vld [vmem:[%s1074_s0 + $0x50] sm:$0xff]  ;;  %v70_v15 = vld [vmem:[%s1074_s0 + $0xc8] sm:$0xff]  ;;  %v72_v17 = vld [vmem:[%s1074_s0 + $0xd8] sm:$0xff] }
   0x5   :  { %498 = vmatprep.subr.bf16.mxu0 %v497_v4  ;;  %v531_v14 = vpack.c.bf16 %v55_v12, %v47_v11  ;;  %530 = vmatprep.subr.bf16.mxu1 %v529_v9  ;;  %v501_v18 = vpack.c.bf16 %v70_v15, %v62_v13  ;;  %v533_v19 = vpack.c.bf16 %v72_v17, %v64_v16  ;;  %v61_v20 = vld [vmem:[%s1074_s0 + $0x80] sm:$0xff]  ;;  %v63_v22 = vld [vmem:[%s1074_s0 + $0x90] sm:$0xff]  ;;  %v78_v25 = vld [vmem:[%s1074_s0 + $0x108] sm:$0xff] }
   0x6   :  { %500 = vmatpush1.bf16.msra.mxu0 %v499_v10  ;;  %v69_v21 = vld [vmem:[%s1074_s0 + $0xc0] sm:$0xff]  ;;  %v71_v24 = vld [vmem:[%s1074_s0 + $0xd0] sm:$0xff]  ;;  %v86_v26 = vld [vmem:[%s1074_s0 + $0x148] sm:$0xff] }
   0x7   :  { %532 = vmatpush1.bf16.msra.mxu1 %v531_v14  ;;  %v503_v23 = vpack.c.bf16 %v69_v21, %v61_v20  ;;  %502 = vmatprep.subr.bf16.mxu0 %v501_v18  ;;  %v535_v27 = vpack.c.bf16 %v71_v24, %v63_v22  ;;  %v505_v28 = vpack.c.bf16 %v86_v26, %v78_v25  ;;  %v80_v29 = vld [vmem:[%s1074_s0 + $0x118] sm:$0xff]  ;;  %v77_v31 = vld [vmem:[%s1074_s0 + $0x100] sm:$0xff]  ;;  %v79_v34 = vld [vmem:[%s1074_s0 + $0x110] sm:$0xff] }
   0x8   :  { %534 = vmatprep.subr.bf16.mxu1 %v533_v19  ;;  %v88_v30 = vld [vmem:[%s1074_s0 + $0x158] sm:$0xff]  ;;  %v85_v33 = vld [vmem:[%s1074_s0 + $0x140] sm:$0xff]  ;;  %v87_v35 = vld [vmem:[%s1074_s0 + $0x150] sm:$0xff] }
   0x9   :  { %v537_v32 = vpack.c.bf16 %v88_v30, %v80_v29  ;;  %v507_v36 = vpack.c.bf16 %v85_v33, %v77_v31  ;;  %v94_v37 = vld [vmem:[%s1074_s0 + $0x188] sm:$0xff]  ;;  %v96_v39 = vld [vmem:[%s1074_s0 + $0x198] sm:$0xff]  ;;  %v539_v40 = vpack.c.bf16 %v87_v35, %v79_v34  ;;  %v93_v43 = vld [vmem:[%s1074_s0 + $0x180] sm:$0xff] }
   0xa   :  { %504 = vmatpush1.bf16.msra.mxu0 %v503_v23  ;;  %v102_v38 = vld [vmem:[%s1074_s0 + $0x1c8] sm:$0xff]  ;;  %v104_v42 = vld [vmem:[%s1074_s0 + $0x1d8] sm:$0xff]  ;;  %v101_v44 = vld [vmem:[%s1074_s0 + $0x1c0] sm:$0xff] }
   0xb   :  { %536 = vmatpush1.bf16.msra.mxu1 %v535_v27  ;;  %506 = vmatprep.subr.bf16.mxu0 %v505_v28  ;;  %v509_v41 = vpack.c.bf16 %v102_v38, %v94_v37  ;;  %v541_v45 = vpack.c.bf16 %v104_v42, %v96_v39  ;;  %v95_v46 = vld [vmem:[%s1074_s0 + $0x190] sm:$0xff]  ;;  %v110_v48 = vld [vmem:[%s1074_s0 + $0x208] sm:$0xff]  ;;  %v112_v50 = vld [vmem:[%s1074_s0 + $0x218] sm:$0xff]  ;;  %v511_v52 = vpack.c.bf16 %v101_v44, %v93_v43 }
   0xc   :  { %538 = vmatprep.subr.bf16.mxu1 %v537_v32  ;;  %v103_v47 = vld [vmem:[%s1074_s0 + $0x1d0] sm:$0xff]  ;;  %v118_v49 = vld [vmem:[%s1074_s0 + $0x248] sm:$0xff]  ;;  %v120_v51 = vld [vmem:[%s1074_s0 + $0x258] sm:$0xff] }
   0xd   :  { %v543_v53 = vpack.c.bf16 %v103_v47, %v95_v46  ;;  %v513_v54 = vpack.c.bf16 %v118_v49, %v110_v48  ;;  %v109_v55 = vld [vmem:[%s1074_s0 + $0x200] sm:$0xff]  ;;  %v111_v57 = vld [vmem:[%s1074_s0 + $0x210] sm:$0xff]  ;;  %v545_v58 = vpack.c.bf16 %v120_v51, %v112_v50  ;;  %v126_v60 = vld [vmem:[%s1074_s0 + $0x288] sm:$0xff] }
   0xe   :  { %508 = vmatpush1.bf16.msra.mxu0 %v507_v36  ;;  %v117_v56 = vld [vmem:[%s1074_s0 + $0x240] sm:$0xff]  ;;  %v119_v59 = vld [vmem:[%s1074_s0 + $0x250] sm:$0xff]  ;;  %v134_v61 = vld [vmem:[%s1074_s0 + $0x2c8] sm:$0xff] }
   0xf   :  { %540 = vmatpush1.bf16.msra.mxu1 %v539_v40  ;;  %510 = vmatprep.subr.bf16.mxu0 %v509_v41  ;;  %v128_v62 = vld [vmem:[%s1074_s0 + $0x298] sm:$0xff]  ;;  %v515_v0 = vpack.c.bf16 %v117_v56, %v109_v55  ;;  %v547_v1 = vpack.c.bf16 %v119_v59, %v111_v57  ;;  %v517_v2 = vpack.c.bf16 %v134_v61, %v126_v60  ;;  %v125_v4 = vld [vmem:[%s1074_s0 + $0x280] sm:$0xff]  ;;  %v127_v6 = vld [vmem:[%s1074_s0 + $0x290] sm:$0xff] }
  0x10   :  { %542 = vmatprep.subr.bf16.mxu1 %v541_v45  ;;  %v136_v63 = vld [vmem:[%s1074_s0 + $0x2d8] sm:$0xff]  ;;  %v133_v5 = vld [vmem:[%s1074_s0 + $0x2c0] sm:$0xff]  ;;  %v135_v8 = vld [vmem:[%s1074_s0 + $0x2d0] sm:$0xff] }
  0x11   :  { %v549_v7 = vpack.c.bf16 %v136_v63, %v128_v62  ;;  %v142_v9 = vld [vmem:[%s1074_s0 + $0x308] sm:$0xff]  ;;  %v144_v11 = vld [vmem:[%s1074_s0 + $0x318] sm:$0xff]  ;;  %v519_v13 = vpack.c.bf16 %v133_v5, %v125_v4  ;;  %v551_v14 = vpack.c.bf16 %v135_v8, %v127_v6  ;;  %v141_v16 = vld [vmem:[%s1074_s0 + $0x300] sm:$0xff] }
  0x12   :  { %512 = vmatpush1.bf16.msra.mxu0 %v511_v52  ;;  %v150_v10 = vld [vmem:[%s1074_s0 + $0x348] sm:$0xff]  ;;  %v152_v12 = vld [vmem:[%s1074_s0 + $0x358] sm:$0xff]  ;;  %v149_v17 = vld [vmem:[%s1074_s0 + $0x340] sm:$0xff] }
  0x13   :  { %544 = vmatpush1.bf16.msra.mxu1 %v543_v53  ;;  %514 = vmatprep.subr.bf16.mxu0 %v513_v54  ;;  %v521_v15 = vpack.c.bf16 %v150_v10, %v142_v9  ;;  %v143_v18 = vld [vmem:[%s1074_s0 + $0x310] sm:$0xff]  ;;  %v553_v19 = vpack.c.bf16 %v152_v12, %v144_v11  ;;  %v158_v21 = vld [vmem:[%s1074_s0 + $0x388] sm:$0xff]  ;;  %v160_v23 = vld [vmem:[%s1074_s0 + $0x398] sm:$0xff]  ;;  %v523_v25 = vpack.c.bf16 %v149_v17, %v141_v16 }
  0x14   :  { %546 = vmatprep.subr.bf16.mxu1 %v545_v58  ;;  %v151_v20 = vld [vmem:[%s1074_s0 + $0x350] sm:$0xff]  ;;  %v166_v22 = vld [vmem:[%s1074_s0 + $0x3c8] sm:$0xff]  ;;  %v168_v24 = vld [vmem:[%s1074_s0 + $0x3d8] sm:$0xff] }
  0x15   :  { %v555_v26 = vpack.c.bf16 %v151_v20, %v143_v18  ;;  %v525_v27 = vpack.c.bf16 %v166_v22, %v158_v21  ;;  %v157_v28 = vld [vmem:[%s1074_s0 + $0x380] sm:$0xff]  ;;  %v159_v30 = vld [vmem:[%s1074_s0 + $0x390] sm:$0xff]  ;;  %v557_v31 = vpack.c.bf16 %v168_v24, %v160_v23  ;;  %v50_v33 = vld [vmem:[%s1074_s0 + $0x28] sm:$0xff] }
  0x16   :  { %516 = vmatpush1.bf16.msra.mxu0 %v515_v0  ;;  %v165_v29 = vld [vmem:[%s1074_s0 + $0x3c0] sm:$0xff]  ;;  %v167_v32 = vld [vmem:[%s1074_s0 + $0x3d0] sm:$0xff]  ;;  %v58_v34 = vld [vmem:[%s1074_s0 + $0x68] sm:$0xff] }
  0x17   :  { %548 = vmatpush1.bf16.msra.mxu1 %v547_v1  ;;  %518 = vmatprep.subr.bf16.mxu0 %v517_v2  ;;  %v52_v35 = vld [vmem:[%s1074_s0 + $0x38] sm:$0xff]  ;;  %v527_v37 = vpack.c.bf16 %v165_v29, %v157_v28  ;;  %v559_v38 = vpack.c.bf16 %v167_v32, %v159_v30  ;;  %v561_v39 = vpack.c.bf16 %v58_v34, %v50_v33  ;;  %v49_v40 = vld [vmem:[%s1074_s0 + $0x20] sm:$0xff]  ;;  %v51_v42 = vld [vmem:[%s1074_s0 + $0x30] sm:$0xff] }
  0x18   :  { %550 = vmatprep.subr.bf16.mxu1 %v549_v7  ;;  %v60_v36 = vld [vmem:[%s1074_s0 + $0x78] sm:$0xff]  ;;  %v57_v41 = vld [vmem:[%s1074_s0 + $0x60] sm:$0xff]  ;;  %v59_v44 = vld [vmem:[%s1074_s0 + $0x70] sm:$0xff] }
  0x19   :  { %v593_v43 = vpack.c.bf16 %v60_v36, %v52_v35  ;;  %v66_v45 = vld [vmem:[%s1074_s0 + $0xa8] sm:$0xff]  ;;  %v68_v47 = vld [vmem:[%s1074_s0 + $0xb8] sm:$0xff]  ;;  %v883_v49 = vld [vmem:[%s1075_s1] sm:$0xff]  ;;  %v563_v50 = vpack.c.bf16 %v57_v41, %v49_v40  ;;  %v595_v51 = vpack.c.bf16 %v59_v44, %v51_v42 }
  0x1a   :  { %520 = vmatpush1.bf16.msra.mxu0 %v519_v13  ;;  %v74_v46 = vld [vmem:[%s1074_s0 + $0xe8] sm:$0xff]  ;;  %v76_v48 = vld [vmem:[%s1074_s0 + $0xf8] sm:$0xff]  ;;  %v65_v53 = vld [vmem:[%s1074_s0 + $0xa0] sm:$0xff] }
  0x1b   :  { %552 = vmatpush1.bf16.msra.mxu1 %v551_v14  ;;  %522 = vmatprep.subr.bf16.mxu0 %v521_v15  ;;  %v565_v52 = vpack.c.bf16 %v74_v46, %v66_v45  ;;  %v73_v54 = vld [vmem:[%s1074_s0 + $0xe0] sm:$0xff]  ;;  %v67_v55 = vld [vmem:[%s1074_s0 + $0xb0] sm:$0xff]  ;;  %v597_v56 = vpack.c.bf16 %v76_v48, %v68_v47  ;;  %v82_v58 = vld [vmem:[%s1074_s0 + $0x128] sm:$0xff] }
  0x1c   :  { %554 = vmatprep.subr.bf16.mxu1 %v553_v19  ;;  %v75_v57 = vld [vmem:[%s1074_s0 + $0xf0] sm:$0xff]  ;;  %v90_v59 = vld [vmem:[%s1074_s0 + $0x168] sm:$0xff]  ;;  %v84_v60 = vld [vmem:[%s1074_s0 + $0x138] sm:$0xff]  ;;  %v567_v62 = vpack.c.bf16 %v73_v54, %v65_v53 }
  0x1d   :  { %v92_v61 = vld [vmem:[%s1074_s0 + $0x178] sm:$0xff]  ;;  %v599_v63 = vpack.c.bf16 %v75_v57, %v67_v55  ;;  %v569_v0 = vpack.c.bf16 %v90_v59, %v82_v58  ;;  %v81_v1 = vld [vmem:[%s1074_s0 + $0x120] sm:$0xff]  ;;  %v83_v4 = vld [vmem:[%s1074_s0 + $0x130] sm:$0xff] }
  0x1e   :  { %524 = vmatpush1.bf16.msra.mxu0 %v523_v25  ;;  %v89_v2 = vld [vmem:[%s1074_s0 + $0x160] sm:$0xff]  ;;  %v601_v5 = vpack.c.bf16 %v92_v61, %v84_v60  ;;  %v91_v6 = vld [vmem:[%s1074_s0 + $0x170] sm:$0xff]  ;;  %v98_v7 = vld [vmem:[%s1074_s0 + $0x1a8] sm:$0xff] }
  0x1f   :  { %556 = vmatpush1.bf16.msra.mxu1 %v555_v26  ;;  %526 = vmatprep.subr.bf16.mxu0 %v525_v27  ;;  %v106_v8 = vld [vmem:[%s1074_s0 + $0x1e8] sm:$0xff]  ;;  %v100_v9 = vld [vmem:[%s1074_s0 + $0x1b8] sm:$0xff]  ;;  %v571_v11 = vpack.c.bf16 %v89_v2, %v81_v1  ;;  %v603_v12 = vpack.c.bf16 %v91_v6, %v83_v4  ;;  %v97_v14 = vld [vmem:[%s1074_s0 + $0x1a0] sm:$0xff] }
  0x20   :  { %558 = vmatprep.subr.bf16.mxu1 %v557_v31  ;;  %v108_v10 = vld [vmem:[%s1074_s0 + $0x1f8] sm:$0xff]  ;;  %v573_v13 = vpack.c.bf16 %v106_v8, %v98_v7  ;;  %v105_v15 = vld [vmem:[%s1074_s0 + $0x1e0] sm:$0xff]  ;;  %v99_v16 = vld [vmem:[%s1074_s0 + $0x1b0] sm:$0xff] }
  0x21   :  { %v107_v17 = vld [vmem:[%s1074_s0 + $0x1f0] sm:$0xff]  ;;  %v114_v18 = vld [vmem:[%s1074_s0 + $0x228] sm:$0xff]  ;;  %v116_v20 = vld [vmem:[%s1074_s0 + $0x238] sm:$0xff]  ;;  %v575_v23 = vpack.c.bf16 %v105_v15, %v97_v14 }
  0x22   :  { %528 = vmatpush1.bf16.msra.mxu0 %v527_v37  ;;  %v122_v19 = vld [vmem:[%s1074_s0 + $0x268] sm:$0xff]  ;;  %v124_v21 = vld [vmem:[%s1074_s0 + $0x278] sm:$0xff]  ;;  %v18_v22 = vld [vmem:[%s1076_s2] sm:$0xff]  ;;  %v607_v24 = vpack.c.bf16 %v107_v17, %v99_v16 }
  0x23   :  { %560 = vmatpush1.bf16.msra.mxu1 %v559_v38  ;;  %562 = vmatprep.subr.bf16.mxu0 %v561_v39  ;;  %v577_v25 = vpack.c.bf16 %v122_v19, %v114_v18  ;;  %v113_v26 = vld [vmem:[%s1074_s0 + $0x220] sm:$0xff]  ;;  %v115_v28 = vld [vmem:[%s1074_s0 + $0x230] sm:$0xff]  ;;  %v609_v29 = vpack.c.bf16 %v124_v21, %v116_v20  ;;  %v130_v31 = vld [vmem:[%s1074_s0 + $0x2a8] sm:$0xff] }
  0x24   :  { %594 = vmatprep.subr.bf16.mxu1 %v593_v43  ;;  %21 = vperm.xlu0 %627, %v18_v22   ;;  %v121_v27 = vld [vmem:[%s1074_s0 + $0x260] sm:$0xff]  ;;  %v123_v30 = vld [vmem:[%s1074_s0 + $0x270] sm:$0xff]  ;;  %v138_v32 = vld [vmem:[%s1074_s0 + $0x2e8] sm:$0xff] }
  0x25   :  { %238 = vmatmul.mubr.f32.vlgmr.msra.gmra.mrb[0].mxu0 %v883_v49  ;;  %v132_v33 = vld [vmem:[%s1074_s0 + $0x2b8] sm:$0xff]  ;;  %v579_v35 = vpack.c.bf16 %v121_v27, %v113_v26  ;;  %v611_v36 = vpack.c.bf16 %v123_v30, %v115_v28  ;;  %v581_v37 = vpack.c.bf16 %v138_v32, %v130_v31  ;;  %v129_v38 = vld [vmem:[%s1074_s0 + $0x2a0] sm:$0xff]  ;;  %v131_v40 = vld [vmem:[%s1074_s0 + $0x2b0] sm:$0xff] }
  0x26   :  { %309 = vmatmul.mubr.f32.vlgmr.msra.gmra.mrb[0].mxu1 %v883_v49  ;;  %564 = vmatpush1.bf16.msra.mxu0 %v563_v50  ;;  %v140_v34 = vld [vmem:[%s1074_s0 + $0x2f8] sm:$0xff]  ;;  %v137_v39 = vld [vmem:[%s1074_s0 + $0x2e0] sm:$0xff]  ;;  %v139_v42 = vld [vmem:[%s1074_s0 + $0x2f0] sm:$0xff] }
  0x27   :  { %596 = vmatpush1.bf16.msra.mxu1 %v595_v51  ;;  %566 = vmatprep.subr.bf16.mxu0 %v565_v52  ;;  %v613_v41 = vpack.c.bf16 %v140_v34, %v132_v33  ;;  %v146_v43 = vld [vmem:[%s1074_s0 + $0x328] sm:$0xff]  ;;  %v148_v45 = vld [vmem:[%s1074_s0 + $0x338] sm:$0xff]  ;;  %v583_v47 = vpack.c.bf16 %v137_v39, %v129_v38  ;;  %v615_v48 = vpack.c.bf16 %v139_v42, %v131_v40  ;;  %v145_v51 = vld [vmem:[%s1074_s0 + $0x320] sm:$0xff] }
  0x28   :  { %598 = vmatprep.subr.bf16.mxu1 %v597_v56  ;;  %379 = vmatprep.mubr.f32.mxu0 %v628_v3  ;;  %v154_v44 = vld [vmem:[%s1074_s0 + $0x368] sm:$0xff]  ;;  %v156_v46 = vld [vmem:[%s1074_s0 + $0x378] sm:$0xff]  ;;  %v153_v52 = vld [vmem:[%s1074_s0 + $0x360] sm:$0xff] }
  0x29   :  { %450 = vmatprep.mubr.f32.mxu1 %v628_v3  ;;  %v605_v3 = vpack.c.bf16 %v108_v10, %v100_v9  ;;  %v585_v50 = vpack.c.bf16 %v154_v44, %v146_v43  ;;  %v147_v53 = vld [vmem:[%s1074_s0 + $0x330] sm:$0xff]  ;;  %v617_v54 = vpack.c.bf16 %v156_v46, %v148_v45  ;;  %v162_v56 = vld [vmem:[%s1074_s0 + $0x3a8] sm:$0xff]  ;;  %v164_v58 = vld [vmem:[%s1074_s0 + $0x3b8] sm:$0xff]  ;;  %v587_v60 = vpack.c.bf16 %v153_v52, %v145_v51 }
  0x2a   :  { %568 = vmatpush1.bf16.msra.mxu0 %v567_v62  ;;  %v155_v55 = vld [vmem:[%s1074_s0 + $0x370] sm:$0xff]  ;;  %v170_v57 = vld [vmem:[%s1074_s0 + $0x3e8] sm:$0xff]  ;;  %v172_v59 = vld [vmem:[%s1074_s0 + $0x3f8] sm:$0xff] }
  0x2b   :  { %600 = vmatpush1.bf16.msra.mxu1 %v599_v63  ;;  %570 = vmatprep.subr.bf16.mxu0 %v569_v0  ;;  %v619_v61 = vpack.c.bf16 %v155_v55, %v147_v53  ;;  %v589_v62 = vpack.c.bf16 %v170_v57, %v162_v56  ;;  %v161_v63 = vld [vmem:[%s1074_s0 + $0x3a0] sm:$0xff]  ;;  %v621_v1 = vpack.c.bf16 %v172_v59, %v164_v58  ;;  %v163_v2 = vld [vmem:[%s1074_s0 + $0x3b0] sm:$0xff] }
  0x2c   :  { %602 = vmatprep.subr.bf16.mxu1 %v601_v5  ;;  %v169_v0 = vld [vmem:[%s1074_s0 + $0x3e0] sm:$0xff]  ;;  %v171_v4 = vld [vmem:[%s1074_s0 + $0x3f0] sm:$0xff] }
  0x2d   :  { %v591_v5 = vpack.c.bf16 %v169_v0, %v161_v63  ;;  %v623_v6 = vpack.c.bf16 %v171_v4, %v163_v2 }
  0x2e   :  { %572 = vmatpush1.bf16.msra.mxu0 %v571_v11 }
  0x2f   :  { %604 = vmatpush1.bf16.msra.mxu1 %v603_v12  ;;  %574 = vmatprep.subr.bf16.mxu0 %v573_v13 }
  0x30   :  { %606 = vmatprep.subr.bf16.mxu1 %v605_v3 }
  0x32   :  { %576 = vmatpush1.bf16.msra.mxu0 %v575_v23 }
  0x33   :  { %608 = vmatpush1.bf16.msra.mxu1 %v607_v24  ;;  %578 = vmatprep.subr.bf16.mxu0 %v577_v25 }
  0x34   :  { %610 = vmatprep.subr.bf16.mxu1 %v609_v29 }
  0x36   :  { %580 = vmatpush1.bf16.msra.mxu0 %v579_v35 }
  0x37   :  { %612 = vmatpush1.bf16.msra.mxu1 %v611_v36  ;;  %582 = vmatprep.subr.bf16.mxu0 %v581_v37 }
  0x38   :  { %614 = vmatprep.subr.bf16.mxu1 %v613_v41 }
  0x3a   :  { %584 = vmatpush1.bf16.msra.mxu0 %v583_v47 }
  0x3b   :  { %616 = vmatpush1.bf16.msra.mxu1 %v615_v48  ;;  %586 = vmatprep.subr.bf16.mxu0 %v585_v50 }
  0x3c   :  { %618 = vmatprep.subr.bf16.mxu1 %v617_v54 }
  0x3e   :  { %588 = vmatpush1.bf16.msra.mxu0 %v587_v60 }
  0x3f   :  { %620 = vmatpush1.bf16.msra.mxu1 %v619_v61  ;;  %590 = vmatprep.subr.bf16.mxu0 %v589_v62 }
  0x40   :  { %622 = vmatprep.subr.bf16.mxu1 %v621_v1 }
  0x42   :  { %592 = vmatpush1.bf16.msra.mxu0 %v591_v5 }
  0x43   :  { %624 = vmatpush1.bf16.msra.mxu1 %v623_v6 }
  0x45   :  { %380 = vmatmul.mubr.f32.vlgmr.msra.gmra.mrb[2].mxu0 %v883_v49 }
  0x46   :  { %451 = vmatmul.mubr.f32.vlgmr.msra.gmra.mrb[2].mxu1 %v883_v49 }
  0xa3   :  { %v22_v7 = vpop.permute.xlu0 %21 }
  0xf8   :  { %v239_v8 = vpop.f32.mrb[0].mxu0 }
  0xf9   :  { %v310_v9 = vpop.f32.mrb[0].mxu1  ;;  %v457_v10 = vadd.f32 %v239_v8, %v22_v7  ;;  %v241_v11 = vpop.f32.mrb[1].mxu0 }
  0xfa   :  { %v459_v12 = vadd.f32 %v310_v9, %v22_v7  ;;  %v458_v13 = vadd.f32 %v241_v11, %v22_v7  ;;  %v312_v14 = vpop.f32.mrb[1].mxu1 }
  0xfb   :  { %484 = vst [vmem:[%s1077_s3] sm:$0xff] %v457_v10  ;;  %v460_v15 = vadd.f32 %v312_v14, %v22_v7 }
  0xfc   :  { %486 = vst [vmem:[%s1077_s3 + $0x10] sm:$0xff] %v459_v12  ;;  %485 = vst [vmem:[%s1077_s3 + $0x8] sm:$0xff] %v458_v13 }
  0xfd   :  { %487 = vst [vmem:[%s1077_s3 + $0x18] sm:$0xff] %v460_v15 }
 0x118   :  { %v381_v49 = vpop.f32.mrb[2].mxu0 }
 0x119   :  { %v461_v16 = vadd.f32 %v381_v49, %v22_v7  ;;  %v452_v3 = vpop.f32.mrb[2].mxu1  ;;  %v383_v17 = vpop.f32.mrb[3].mxu0 }
 0x11a   :  { %v463_v18 = vadd.f32 %v452_v3, %v22_v7  ;;  %v462_v19 = vadd.f32 %v383_v17, %v22_v7  ;;  %v454_v20 = vpop.f32.mrb[3].mxu1 }
 0x11b   :  { %488 = vst [vmem:[%s1077_s3 + $0x20] sm:$0xff] %v461_v16  ;;  %v464_v21 = vadd.f32 %v454_v20, %v22_v7 }
 0x11c   :  { %490 = vst [vmem:[%s1077_s3 + $0x30] sm:$0xff] %v463_v18  ;;  %489 = vst [vmem:[%s1077_s3 + $0x28] sm:$0xff] %v462_v19 }
 0x11d   :  { %491 = vst [vmem:[%s1077_s3 + $0x38] sm:$0xff] %v464_v21 }

</bundles_post_ra>
